<compile_context>
chip_gen: v5e
topology: v5e:2x2
jax: 0.10.0
libtpu: 0.0.40
codegen_flags: <defaults>
</compile_context>

<pallas_src>
import functools

import jax
import jax.numpy as jnp
from jax.experimental import pallas as pl
from jax.experimental.pallas import tpu as pltpu


def _ff2_kernel(x_ref, w_ref, o_ref, *, d, bias_val):
    x = x_ref[...]                      # (TM, L) packed [xr | xi | pad], float32
    # grad_2 - grad_1 (scaled by step_size), one MXU call on the packed slab.
    g = jnp.dot(x, w_ref[...], preferred_element_type=jnp.float32)

    # step_size * lambd is a real scalar -> subtract it from the real lanes only.
    lane = jax.lax.broadcasted_iota(jnp.int32, (1, x.shape[-1]), 1)
    offset = jnp.where(lane < d, jnp.float32(bias_val), jnp.float32(0.0))

    # CReLU on the packed slab: relu(real) | relu(imag), one lane-dense store.
    o_ref[...] = jnp.maximum(x + g - offset, 0.0)


def _pick_tile_m(m, lanes):
    """Largest M-tile s.t. weight + 2 double-buffered (tm, lanes) f32 tiles fit
    comfortably in scoped VMEM (~28 MiB budget), capped at 512 rows."""
    budget = 28 * 1024 * 1024 - lanes * lanes * 4
    tm_cap = max(budget // (4 * lanes * 4), 8)
    tm = min(512, int(tm_cap), ((m + 7) // 8) * 8)
    return max(8, (tm // 8) * 8)


def feedforward2_pallas(x_real, x_imag, w_real, w_imag, step_size=0.1, lambd=0.1):
    """x_real/x_imag: (B, S, D) float32; w_real/w_imag: (D, D) float32.

    Returns (out_real, out_imag), each (B, S, D) float32.
    """
    B, S, D = x_real.shape
    M = B * S
    two_d = 2 * D
    lanes = ((two_d + 127) // 128) * 128          # pad lane axis to multiple of 128
    hp = jax.lax.Precision.HIGHEST

    wr = w_real.astype(jnp.float32)
    wi = w_imag.astype(jnp.float32)

    # T = W^T @ W (complex);  W_eff = step_size * (W - T)
    tr = jnp.dot(wr.T, wr, precision=hp) - jnp.dot(wi.T, wi, precision=hp)
    ti = jnp.dot(wr.T, wi, precision=hp) + jnp.dot(wi.T, wr, precision=hp)
    ar = jnp.float32(step_size) * (wr - tr)
    ai = jnp.float32(step_size) * (wi - ti)

    # Packed weight block for  u @ A  with A = W_eff:  [[Ar, Ai], [-Ai, Ar]]
    w_p = jnp.concatenate(
        [jnp.concatenate([ar, ai], axis=1),
         jnp.concatenate([-ai, ar], axis=1)], axis=0)
    if lanes != two_d:
        w_p = jnp.pad(w_p, ((0, lanes - two_d), (0, lanes - two_d)))

    # Pack real/imag along the lane axis: (M, lanes).
    xp = jnp.concatenate(
        [x_real.reshape(M, D), x_imag.reshape(M, D)], axis=-1).astype(jnp.float32)
    if lanes != two_d:
        xp = jnp.pad(xp, ((0, 0), (0, lanes - two_d)))

    tm = _pick_tile_m(M, lanes)
    n_tiles = pl.cdiv(M, tm)
    m_pad = n_tiles * tm
    if m_pad != M:
        xp = jnp.pad(xp, ((0, m_pad - M), (0, 0)))

    kernel = functools.partial(
        _ff2_kernel, d=D, bias_val=float(step_size) * float(lambd))

    out = pl.pallas_call(
        kernel,
        out_shape=jax.ShapeDtypeStruct((m_pad, lanes), jnp.float32),
        grid=(n_tiles,),
        in_specs=[
            pl.BlockSpec((tm, lanes), lambda i: (i, 0)),        # X tiles (pipelined)
            pl.BlockSpec((lanes, lanes), lambda i: (0, 0)),     # packed W resident
        ],
        out_specs=pl.BlockSpec((tm, lanes), lambda i: (i, 0)),
        compiler_params=pltpu.CompilerParams(
            dimension_semantics=("parallel",)),
    )(xp, w_p)

    out = out[:M]
    out_r = out[:, :D].reshape(B, S, D)
    out_i = out[:, D:two_d].reshape(B, S, D)
    return out_r, out_i


def _reference(x_real, x_imag, w_real, w_imag, step_size=0.1, lambd=0.1):
    """Pure-JAX reference following the PyTorch forward literally (no packing)."""
    hp = jax.lax.Precision.HIGHEST

    def cmm(ar, ai, br, bi):  # (ar + i*ai) @ (br + i*bi), batched over (B, S)
        rr = (jnp.einsum('bsd,de->bse', ar, br, precision=hp)
              - jnp.einsum('bsd,de->bse', ai, bi, precision=hp))
        ri = (jnp.einsum('bsd,de->bse', ar, bi, precision=hp)
              + jnp.einsum('bsd,de->bse', ai, br, precision=hp))
        return rr, ri

    # x1 = F.linear(x, W) = x @ W^T
    x1r, x1i = cmm(x_real, x_imag, w_real.T, w_imag.T)
    # grad_1 = F.linear(x1, W.t()) = x1 @ W
    g1r, g1i = cmm(x1r, x1i, w_real, w_imag)
    # grad_2 = F.linear(x, W.t()) = x @ W
    g2r, g2i = cmm(x_real, x_imag, w_real, w_imag)

    gr = step_size * (g2r - g1r) - step_size * lambd   # real scalar hits real part
    gi = step_size * (g2i - g1i)
    zr, zi = x_real + gr, x_imag + gi
    return jnp.maximum(zr, 0.0), jnp.maximum(zi, 0.0)


if __name__ == "__main__":
    B, S, D = 2, 8, 32
    key = jax.random.PRNGKey(0)
    k1, k2, k3, k4 = jax.random.split(key, 4)

    # deterministic parameter init (kaiming_uniform-like: U(-sqrt(6/fan_in), +))
    bound = (6.0 / D) ** 0.5
    w_real = jax.random.uniform(k1, (D, D), jnp.float32, -bound, bound)
    w_imag = jax.random.uniform(k2, (D, D), jnp.float32, -bound, bound)

    x_real = jax.random.normal(k3, (B, S, D), jnp.float32)
    x_imag = jax.random.normal(k4, (B, S, D), jnp.float32)

    out_r, out_i = feedforward2_pallas(x_real, x_imag, w_real, w_imag)
    jax.block_until_ready((out_r, out_i))

    ref_r, ref_i = _reference(x_real, x_imag, w_real, w_imag)
    assert jnp.allclose(out_r, ref_r, atol=1e-4, rtol=1e-4)
    assert jnp.allclose(out_i, ref_i, atol=1e-4, rtol=1e-4)

    print("KERNEL_OK")
</pallas_src>

<mosaic_0001>
module attributes {stable_mosaic.version = 11 : i64} {
  func.func @_ff2_kernel(%arg0: i32, %arg1: memref<16x128xf32, #tpu.memory_space<vmem>>, %arg2: memref<128x128xf32, #tpu.memory_space<vmem>>, %arg3: memref<16x128xf32, #tpu.memory_space<vmem>>) attributes {dimension_semantics = [#tpu.dimension_semantics<parallel>], iteration_bounds = array<i64: 1>, scalar_prefetch = 0 : i64, scratch_operands = 0 : i64, tpu.core_type = #tpu.core_type<tc>, window_params = [{transform_indices = @transform_0, window_bounds = array<i64: 16, 128>}, {pipeline_mode = #tpu.pipeline_mode<synchronous>, transform_indices = @transform_1, window_bounds = array<i64: 128, 128>}, {transform_indices = @transform_2, window_bounds = array<i64: 16, 128>}]} {
    %c0 = arith.constant 0 : index
    %c0_0 = arith.constant 0 : index
    %0 = vector.load %arg1[%c0, %c0_0] : memref<16x128xf32, #tpu.memory_space<vmem>>, vector<16x128xf32>
    %c0_1 = arith.constant 0 : index
    %c0_2 = arith.constant 0 : index
    %1 = vector.load %arg2[%c0_1, %c0_2] : memref<128x128xf32, #tpu.memory_space<vmem>>, vector<128x128xf32>
    %cst = arith.constant dense<0.000000e+00> : vector<16x128xf32>
    %2 = tpu.matmul %0, %1, %cst {dimension_numbers = #tpu.dot_dimension_numbers<[1], [0], [0], [1], [0, 0, 1, 1], [], []>} : vector<16x128xf32>, vector<128x128xf32>, vector<16x128xf32> -> vector<16x128xf32>
    %3 = tpu.iota {dimensions = array<i32: 1>} : vector<1x128xi32>
    %c32_i32 = arith.constant 32 : i32
    %4 = vector.broadcast %c32_i32 : i32 to vector<1x128xi32>
    %5 = arith.cmpi slt, %3, %4 : vector<1x128xi32>
    %cst_3 = arith.constant 0.00999999977 : f32
    %cst_4 = arith.constant 0.000000e+00 : f32
    %6 = vector.broadcast %cst_3 : f32 to vector<1x128xf32>
    %7 = vector.broadcast %cst_4 : f32 to vector<1x128xf32>
    %8 = arith.select %5, %6, %7 : vector<1x128xi1>, vector<1x128xf32>
    %9 = arith.addf %0, %2 : vector<16x128xf32>
    %10 = vector.broadcast %8 : vector<1x128xf32> to vector<16x128xf32>
    %11 = arith.subf %9, %10 : vector<16x128xf32>
    %cst_5 = arith.constant 0.000000e+00 : f32
    %12 = vector.broadcast %cst_5 : f32 to vector<16x128xf32>
    %13 = arith.maximumf %11, %12 : vector<16x128xf32>
    %c0_6 = arith.constant 0 : index
    %c0_7 = arith.constant 0 : index
    %14 = vector.load %arg3[%c0_6, %c0_7] : memref<16x128xf32, #tpu.memory_space<vmem>>, vector<16x128xf32>
    tpu.vector_store %arg3[%c0_6, %c0_7], %13 {strides = array<i32>} : memref<16x128xf32, #tpu.memory_space<vmem>>, vector<16x128xf32>,
    return
  }
  func.func @transform_0(%arg0: i32) -> (i32, i32) {
    %c0_i32 = arith.constant 0 : i32
    %c0_i32_0 = arith.constant 0 : i32
    return %arg0, %c0_i32 : i32, i32
  }
  func.func @transform_1(%arg0: i32) -> (i32, i32) {
    %c0_i32 = arith.constant 0 : i32
    %c0_i32_0 = arith.constant 0 : i32
    %c0_i32_1 = arith.constant 0 : i32
    return %c0_i32, %c0_i32_0 : i32, i32
  }
  func.func @transform_2(%arg0: i32) -> (i32, i32) {
    %c0_i32 = arith.constant 0 : i32
    %c0_i32_0 = arith.constant 0 : i32
    return %arg0, %c0_i32 : i32, i32
  }
}

</mosaic_0001>

<bundles_post_ra>
// kernel: tpu_custom_call.1
= control target key start
LH: loop header
LB: loop body
LE: loop exit
PB: predicated region body
PF: predicated region fallthrough
CT: control target
= control target key end

     0   :  { %7 = vsyncpa [#allocation3], 0  ;;  %s256_s0 = inlined_call_operand.hbm [shape: f32[16,128], index: 0, kind: input, shape index: {}]   ;;  %s257_s1 = inlined_call_operand.hbm [shape: f32[128,128], index: 1, kind: input, shape index: {}]   ;;  %s258_s2 = inlined_call_operand.hbm [shape: f32[16,128], index: 2, kind: output, shape index: {}]  }
   0x1   :  { %8 = vsyncpa [#allocation6], 0 }
   0x2   :  { %9 = vsyncpa [#allocation4], 0  ;;  %s14_s11 = sshll.u32 %s256_s0, 4  ;;  %s217_s12 = smov [#allocation2]   ;;  %s15_s11 = int_to_ptr.hbm [resolvable:$true] %s14_s11 }
   0x3   :  { %s16_s13 = sshll.u32 %s217_s12, 4  ;;  %s27_s16 = sshll.u32 %s257_s1, 4  ;;  %s17_s13 = int_to_ptr.vmem [resolvable:$true] %s16_s13  ;;  %s28_s16 = int_to_ptr.hbm [resolvable:$true] %s27_s16 }
   0x4   :  { %s218_s17 = smov 128   ;;  %s219_s18 = smov 8  }
   0x5   :  { %22 = dma.hbm_to_vmem [thread:$0]  %s15_s11, 256, %s17_s13, [#allocation3], %s218_s17, %s218_s17, %s219_s18  }
   0x6   :  { %s220_s19 = smov [#allocation5]  }
   0x7   :  { %s29_s20 = sshll.u32 %s220_s19, 4  ;;  %s30_s20 = int_to_ptr.vmem [resolvable:$true] %s29_s20 }
   0x8   :  { %35 = dma.hbm_to_vmem [thread:$0]  %s28_s16, 2048, %s30_s20, [#allocation6], %s218_s17, %s218_s17, %s219_s18  }
   0x9   :  { %211 = dma.done.wait [#allocation3], 256  }
   0xa   :  { %212 = vsyncadd [#allocation3], 4294967040 }
   0xb   :  { %213 = dma.done.wait [#allocation6], 2048  }
   0xc   :  { %214 = vsyncadd [#allocation6], 4294965248  ;;  %v61_v0 = vld [vmem:[#allocation5 + $0x78] sm:$0xff]  ;;  %v60_v1 = vld [vmem:[#allocation5 + $0x70] sm:$0xff]  ;;  %v85_v18 = vlaneseq  ;;  %v221_v21 = vmov 0.0   ;;  %s222_s0 = smov [#allocation7]  }
   0xd   :  { %62 = vmatpush.msra.mxu0 %v61_v0  ;;  %117 = vmatpush.msra.mxu1 %v61_v0  ;;  %v59_v2 = vld [vmem:[#allocation5 + $0x68] sm:$0xff]  ;;  %v58_v3 = vld [vmem:[#allocation5 + $0x60] sm:$0xff]  ;;  %v57_v4 = vld [vmem:[#allocation5 + $0x58] sm:$0xff]  ;;  %s101_s1 = sshll.u32 %s222_s0, 4  ;;  %s103_s23 = sshll.u32 %s258_s2, 4  ;;  %s102_s1 = int_to_ptr.vmem [resolvable:$true] %s101_s1  ;;  %s104_s23 = int_to_ptr.hbm [resolvable:$true] %s103_s23 }
   0xe   :  { %v56_v5 = vld [vmem:[#allocation5 + $0x50] sm:$0xff]  ;;  %v55_v6 = vld [vmem:[#allocation5 + $0x48] sm:$0xff]  ;;  %v54_v7 = vld [vmem:[#allocation5 + $0x40] sm:$0xff]  ;;  %v86_v19 = vand.u32 127, %v85_v18 }
   0xf   :  { %63 = vmatpush.msra.mxu0 %v60_v1  ;;  %118 = vmatpush.msra.mxu1 %v60_v1  ;;  %v53_v8 = vld [vmem:[#allocation5 + $0x38] sm:$0xff]  ;;  %v52_v9 = vld [vmem:[#allocation5 + $0x30] sm:$0xff]  ;;  %v51_v10 = vld [vmem:[#allocation5 + $0x28] sm:$0xff] }
  0x10   :  { %v50_v11 = vld [vmem:[#allocation5 + $0x20] sm:$0xff]  ;;  %v49_v12 = vld [vmem:[#allocation5 + $0x18] sm:$0xff]  ;;  %v48_v13 = vld [vmem:[#allocation5 + $0x10] sm:$0xff]  ;;  %vm87_vm0 = vcmp.lt.s32.totalorder %v86_v19, 32 }
  0x11   :  { %64 = vmatpush.msra.mxu0 %v59_v2  ;;  %119 = vmatpush.msra.mxu1 %v59_v2  ;;  %v47_v14 = vld [vmem:[#allocation5 + $0x8] sm:$0xff]  ;;  %v46_v15 = vld [vmem:[#allocation5] sm:$0xff]  ;;  %v44_v16 = vld [vmem:[#allocation2] sm:$0xff]  ;;  %v88_v22 = vsel %vm87_vm0, 0.01, %v221_v21 }
  0x12   :  { %v45_v17 = vld [vmem:[#allocation2 + $0x8] sm:$0xff] }
  0x13   :  { %65 = vmatpush.msra.mxu0 %v58_v3  ;;  %120 = vmatpush.msra.mxu1 %v58_v3 }
  0x15   :  { %66 = vmatpush.msra.mxu0 %v57_v4  ;;  %121 = vmatpush.msra.mxu1 %v57_v4 }
  0x17   :  { %67 = vmatpush.msra.mxu0 %v56_v5  ;;  %122 = vmatpush.msra.mxu1 %v56_v5 }
  0x19   :  { %68 = vmatpush.msra.mxu0 %v55_v6  ;;  %123 = vmatpush.msra.mxu1 %v55_v6 }
  0x1b   :  { %69 = vmatpush.msra.mxu0 %v54_v7  ;;  %124 = vmatpush.msra.mxu1 %v54_v7 }
  0x1d   :  { %70 = vmatpush.msra.mxu0 %v53_v8  ;;  %125 = vmatpush.msra.mxu1 %v53_v8 }
  0x1f   :  { %71 = vmatpush.msra.mxu0 %v52_v9  ;;  %126 = vmatpush.msra.mxu1 %v52_v9 }
  0x21   :  { %72 = vmatpush.msra.mxu0 %v51_v10  ;;  %127 = vmatpush.msra.mxu1 %v51_v10 }
  0x23   :  { %73 = vmatpush.msra.mxu0 %v50_v11  ;;  %128 = vmatpush.msra.mxu1 %v50_v11 }
  0x25   :  { %74 = vmatpush.msra.mxu0 %v49_v12  ;;  %129 = vmatpush.msra.mxu1 %v49_v12 }
  0x27   :  { %75 = vmatpush.msra.mxu0 %v48_v13  ;;  %130 = vmatpush.msra.mxu1 %v48_v13 }
  0x29   :  { %76 = vmatpush.msra.mxu0 %v47_v14  ;;  %131 = vmatpush.msra.mxu1 %v47_v14 }
  0x2b   :  { %77 = vmatpush.msra.mxu0 %v46_v15  ;;  %132 = vmatpush.msra.mxu1 %v46_v15 }
  0x2c   :  { %78 = vmatmul.f32.vlgmr.msra.gmra.mxu0 %v44_v16  ;;  %81 = vmatmul.f32.vlgmr.msra.gmra.mxu1 %v45_v17 }
  0xa9   :  { %v79_v20 = vpop.f32.mrf.mxu0  ;;  %v82_v23 = vpop.f32.mrf.mxu1 }
  0xaa   :  { %v89_v24 = vadd.f32 %v79_v20, %v44_v16  ;;  %v90_v25 = vadd.f32 %v82_v23, %v45_v17 }
  0xac   :  { %v91_v26 = vsub.f32 %v89_v24, %v88_v22  ;;  %v92_v27 = vsub.f32 %v90_v25, %v88_v22 }
  0xae   :  { %v93_v28 = vmax.f32 %v91_v26, 0.0  ;;  %v94_v29 = vmax.f32 %v92_v27, 0.0 }
  0xb0   :  { %95 = vst [vmem:[#allocation7] sm:$0xff] %v93_v28 }
  0xb1   :  { %96 = vst [vmem:[#allocation7 + $0x8] sm:$0xff] %v94_v29 }
  0xb2   :  { %109 = dma.vmem_to_hbm [thread:$0]  %s102_s1, 256, %s104_s23, [#allocation4], %s218_s17, %s218_s17, %s219_s18  }
  0xb3   :  { %215 = dma.done.wait [#allocation4], 256  }
  0xb4   :  { %216 = vsyncadd [#allocation4], 4294967040 }
  0xb5   :  { %114 = vsyncpa [#allocation3], 1 }
  0xb6   :  { %115 = vsyncpa [#allocation6], 1 }
  0xb7   :  { %116 = vsyncpa [#allocation4], 1 }

</bundles_post_ra>
